<compile_context>
chip_gen: v6e
topology: v6e:2x2x1
jax: 0.10.0
libtpu: 0.0.40
codegen_flags: <defaults>
</compile_context>

<pallas_src>
import jax
import jax.numpy as jnp
from jax.experimental import pallas as pl
from jax.experimental.pallas import tpu as pltpu

LANE = 128


def _round_up(x, m):
    return -(-x // m) * m


# ---------------------------------------------------------------------------
# Pallas kernel: one batch tile of the CNF dynamics (batch on lanes)
# ---------------------------------------------------------------------------
def _cnf_kernel(zT_ref, w_ref, u_ref, b_ref, wu_ref, dzT_ref, dlp_ref):
    # zT_ref : (D, TB)  z transposed, batch along lanes
    # w_ref  : (K, D)   resident across the grid
    # u_ref  : (K, D)   resident, already scaled by 1/width
    # b_ref  : (K, 1)   resident
    # wu_ref : (K, 1)   resident, = -(1/width) * sum_d w[k,d]*u[k,d]
    # dzT_ref: (D, TB)  output tile (dz_dt transposed)
    # dlp_ref: (1, TB)  lane-dense trace output
    width, input_dim = w_ref.shape          # static Python ints
    tb = zT_ref.shape[-1]

    zT = zT_ref[...]                        # (D, TB)
    w = w_ref[...]                          # (K, D)
    u = u_ref[...]                          # (K, D)  (pre-scaled by 1/width)

    # s[k, n] = sum_d w[k, d] * z[d, n] + b[k]
    # D is tiny: unrolled VPU broadcast-multiply-accumulate (no MXU).
    s = jnp.broadcast_to(b_ref[...], (width, tb))
    for d in range(input_dim):
        s = s + w[:, d:d + 1] * zT[d:d + 1, :]
    th = jnp.tanh(s)                        # (K, TB)   EUP

    # dz[d, n] = sum_k u_scaled[k, d] * th[k, n]
    # lane-broadcast of the u column (VPU mul) + sublane reduce (XLU); each row
    # store is a full-width lane-dense (1, TB) write into the output block.
    for d in range(input_dim):
        dzT_ref[d:d + 1, :] = jnp.sum(u[:, d:d + 1] * th, axis=0,
                                      keepdims=True).astype(dzT_ref.dtype)

    # dlog_p[n] = sum_k wu_neg[k] * (1 - th[k, n]^2)
    # (review: avoid the degenerate M=1 MXU matmul — VPU mul + XLU sublane sum)
    one_minus = 1.0 - th * th
    dlp_ref[...] = jnp.sum(wu_ref[...] * one_minus, axis=0,
                           keepdims=True).astype(dlp_ref.dtype)


# ---------------------------------------------------------------------------
# Plain-XLA math: exact f32, used as small-batch fallback and as the reference
# ---------------------------------------------------------------------------
def cnf_xla(z, w, u, b):
    width = w.shape[0]
    s = jnp.sum(z[:, None, :] * w[None, :, :], axis=-1) + b[None, :]     # (N, K)
    th = jnp.tanh(s)
    dz = jnp.sum(th[:, :, None] * u[None, :, :], axis=1) / width         # (N, D)
    wu = jnp.sum(w * u, axis=1)                                          # (K,)
    dlp = -jnp.sum((1.0 - th * th) * wu[None, :], axis=1,
                   keepdims=True) / width                                # (N, 1)
    return dz, dlp


# ---------------------------------------------------------------------------
# Pallas wrapper
# ---------------------------------------------------------------------------
def cnf_pallas(z, w, u, b, *, tb=8192, min_pallas_batch=0):
    """dz_dt, dlog_p_dt for the CNF dynamics at one time step."""
    z = z.astype(jnp.float32)
    w = w.astype(jnp.float32)
    u = u.astype(jnp.float32)
    batch, input_dim = z.shape
    width = w.shape[0]

    if batch < min_pallas_batch:
        # Below a few thousand rows the pallas_call fixed cost dominates; the
        # review recommends plain XLA there (~4K threshold at D=4, K=8).
        return cnf_xla(z, w, u, b.astype(jnp.float32))

    # Hoisted once per hypernet evaluation (not per tile): 1/width scale,
    # trace negation and the cross-feature w*u reduction.
    inv_width = jnp.float32(1.0 / width)
    u_scaled = u * inv_width                                           # (K, D)
    wu_neg = -(jnp.sum(w * u, axis=1, keepdims=True) * inv_width)      # (K, 1)
    b_col = b.reshape(width, 1).astype(jnp.float32)

    # Batch-on-lanes slab: one transpose in the wrapper buys lane-dense,
    # contiguous z / dz DMAs for every tile.
    zT = z.T                                                           # (D, batch)

    # Tile sizing: lane-dense tiles (multiple of 128), large by default to
    # amortize the ~0.35 us/grid-step overhead, and >= 2 tiles whenever the
    # batch allows so "parallel" can shard across v7x's two TensorCores.
    tb = max(LANE, (int(tb) // LANE) * LANE)
    padded = _round_up(batch, LANE)
    if padded <= LANE:
        tile = padded                          # tiny batch: single 128-lane tile
    else:
        padded = _round_up(batch, 2 * LANE)    # even number of 128-lane groups
        tile = min(tb, padded // 2)            # >= 2 tiles (megacore)
        padded = _round_up(padded, tile)
    num_tiles = padded // tile

    if padded != batch:
        zT = jnp.pad(zT, ((0, 0), (0, padded - batch)))

    cost = pl.CostEstimate(
        flops=4 * padded * width * input_dim + 4 * padded * width,
        transcendentals=padded * width,
        bytes_accessed=4 * (2 * input_dim * padded + padded
                            + 3 * width * input_dim + 2 * width),
    )

    dzT, dlp = pl.pallas_call(
        _cnf_kernel,
        out_shape=(
            jax.ShapeDtypeStruct((input_dim, padded), jnp.float32),   # dz_dt^T
            jax.ShapeDtypeStruct((1, padded), jnp.float32),           # dlog_p_dt
        ),
        grid=(num_tiles,),
        in_specs=[
            pl.BlockSpec((input_dim, tile), lambda i: (0, i)),   # z^T tile
            pl.BlockSpec((width, input_dim), lambda i: (0, 0)),  # w (resident)
            pl.BlockSpec((width, input_dim), lambda i: (0, 0)),  # u/width (resident)
            pl.BlockSpec((width, 1), lambda i: (0, 0)),          # b column
            pl.BlockSpec((width, 1), lambda i: (0, 0)),          # -sum_d(w*u)/width
        ],
        out_specs=(
            pl.BlockSpec((input_dim, tile), lambda i: (0, i)),   # dz^T tile
            pl.BlockSpec((1, tile), lambda i: (0, i)),           # dlp row
        ),
        compiler_params=pltpu.CompilerParams(
            dimension_semantics=("parallel",),
        ),
        cost_estimate=cost,
    )(zT, w, u_scaled, b_col, wu_neg)

    dz = dzT.T[:batch]
    dlp = dlp.reshape(padded, 1)[:batch]
    return dz, dlp


# ---------------------------------------------------------------------------
# Hyper-network glue (tiny MLP on scalar t) + deterministic parameter init
# ---------------------------------------------------------------------------
def init_params(key, input_dim, hidden_dims, width):
    block_dim = input_dim * width
    dims = [1] + list(hidden_dims)
    params = {"mlp": []}
    for i in range(len(hidden_dims)):
        key, k1, k2 = jax.random.split(key, 3)
        W = jax.random.normal(k1, (dims[i + 1], dims[i]), jnp.float32) * 0.3
        b = jax.random.normal(k2, (dims[i + 1],), jnp.float32) * 0.1
        params["mlp"].append((W, b))
    h_last = hidden_dims[-1]
    for name, out_dim in (("u", block_dim), ("w", block_dim), ("b", width)):
        key, k1, k2 = jax.random.split(key, 3)
        params["W" + name] = jax.random.normal(k1, (out_dim, h_last), jnp.float32) * 0.3
        params["b" + name] = jax.random.normal(k2, (out_dim,), jnp.float32) * 0.1
    return params


def hypernet(params, t, input_dim, width):
    # _get_u_w_b: scalar t -> [Linear, Tanh]* -> u/w/b heads
    x = jnp.reshape(jnp.asarray(t, jnp.float32), (1,))
    for W, b in params["mlp"]:
        x = jnp.tanh(W @ x + b)
    u = (params["Wu"] @ x + params["bu"]).reshape(width, input_dim)  # (K,1,D)->(K,D)
    w = (params["Ww"] @ x + params["bw"]).reshape(width, input_dim)  # (K,D,1)->(K,D)
    b = (params["Wb"] @ x + params["bb"])                            # (K,1,1)->(K,)
    return u, w, b


def cnf_forward(params, t, ode_input, input_dim, width, *, tb=8192,
                min_pallas_batch=0):
    """Equivalent of ContiguousNormalizedFlow.forward(t, ode_input)."""
    z, _unused_dlogp = ode_input
    u, w, b = hypernet(params, t, input_dim, width)
    dz_dt, dlog_p_dt = cnf_pallas(z, w, u, b, tb=tb,
                                  min_pallas_batch=min_pallas_batch)
    return dz_dt, dlog_p_dt


# TODO(synk): _flow/log_prob/calc_probability need a dopri5 odeint driver and
# MultivariateNormal.log_prob; only the module's forward() (the ODE dynamics)
# is implemented as a Pallas kernel.


# ---------------------------------------------------------------------------
# Pure-JAX reference (mirrors the PyTorch math, exact f32) for correctness
# ---------------------------------------------------------------------------
def cnf_reference(params, t, z, input_dim, width):
    u, w, b = hypernet(params, t, input_dim, width)
    return cnf_xla(z.astype(jnp.float32), w, u, b)


if __name__ == "__main__":
    input_dim, hidden_dims, width = 4, [32, 32], 8

    key = jax.random.PRNGKey(0)
    kp, kz1, kz2 = jax.random.split(key, 3)
    params = init_params(kp, input_dim, hidden_dims, width)
    t = jnp.float32(0.5)

    # --- small demo batch (single 128-lane tile after padding) ----------------
    batch = 8
    z = jax.random.normal(kz1, (batch, input_dim), jnp.float32)
    dlog_p0 = jnp.zeros((batch, 1), jnp.float32)

    dz_dt, dlog_p_dt = cnf_forward(params, t, (z, dlog_p0), input_dim, width)
    jax.block_until_ready((dz_dt, dlog_p_dt))

    dz_ref, dlp_ref = cnf_reference(params, t, z, input_dim, width)
    assert dz_dt.shape == (batch, input_dim)
    assert dlog_p_dt.shape == (batch, 1)
    assert jnp.allclose(dz_dt, dz_ref, atol=1e-4, rtol=1e-4)
    assert jnp.allclose(dlog_p_dt, dlp_ref, atol=1e-4, rtol=1e-4)

    # --- ragged batch exercising the multi-tile / padded path -----------------
    batch2 = 200  # padded to 256 -> 2 parallel tiles of 128 lanes
    z2 = jax.random.normal(kz2, (batch2, input_dim), jnp.float32)
    dz2, dlp2 = cnf_forward(params, t, (z2, jnp.zeros((batch2, 1), jnp.float32)),
                            input_dim, width)
    jax.block_until_ready((dz2, dlp2))
    dz2_ref, dlp2_ref = cnf_reference(params, t, z2, input_dim, width)
    assert dz2.shape == (batch2, input_dim)
    assert dlp2.shape == (batch2, 1)
    assert jnp.allclose(dz2, dz2_ref, atol=1e-4, rtol=1e-4)
    assert jnp.allclose(dlp2, dlp2_ref, atol=1e-4, rtol=1e-4)

    print("KERNEL_OK")
</pallas_src>

<mosaic_0001>
module attributes {stable_mosaic.version = 11 : i64} {
  func.func @_cnf_kernel(%arg0: i32, %arg1: memref<4x128xf32, #tpu.memory_space<vmem>>, %arg2: memref<8x4xf32, #tpu.memory_space<vmem>>, %arg3: memref<8x4xf32, #tpu.memory_space<vmem>>, %arg4: memref<8x1xf32, #tpu.memory_space<vmem>>, %arg5: memref<8x1xf32, #tpu.memory_space<vmem>>, %arg6: memref<4x128xf32, #tpu.memory_space<vmem>>, %arg7: memref<1x128xf32, #tpu.memory_space<vmem>>) attributes {dimension_semantics = [#tpu.dimension_semantics<parallel>], iteration_bounds = array<i64: 1>, scalar_prefetch = 0 : i64, scratch_operands = 0 : i64, tpu.core_type = #tpu.core_type<tc>, window_params = [{transform_indices = @transform_0, window_bounds = array<i64: 4, 128>}, {pipeline_mode = #tpu.pipeline_mode<synchronous>, transform_indices = @transform_1, window_bounds = array<i64: 8, 4>}, {pipeline_mode = #tpu.pipeline_mode<synchronous>, transform_indices = @transform_2, window_bounds = array<i64: 8, 4>}, {pipeline_mode = #tpu.pipeline_mode<synchronous>, transform_indices = @transform_3, window_bounds = array<i64: 8, 1>}, {pipeline_mode = #tpu.pipeline_mode<synchronous>, transform_indices = @transform_4, window_bounds = array<i64: 8, 1>}, {transform_indices = @transform_5, window_bounds = array<i64: 4, 128>}, {transform_indices = @transform_6, window_bounds = array<i64: 1, 128>}]} {
    %c0 = arith.constant 0 : index
    %c0_0 = arith.constant 0 : index
    %0 = vector.load %arg1[%c0, %c0_0] : memref<4x128xf32, #tpu.memory_space<vmem>>, vector<4x128xf32>
    %c0_1 = arith.constant 0 : index
    %c0_2 = arith.constant 0 : index
    %1 = vector.load %arg2[%c0_1, %c0_2] : memref<8x4xf32, #tpu.memory_space<vmem>>, vector<8x4xf32>
    %c0_3 = arith.constant 0 : index
    %c0_4 = arith.constant 0 : index
    %2 = vector.load %arg3[%c0_3, %c0_4] : memref<8x4xf32, #tpu.memory_space<vmem>>, vector<8x4xf32>
    %c0_5 = arith.constant 0 : index
    %c0_6 = arith.constant 0 : index
    %3 = vector.load %arg4[%c0_5, %c0_6] : memref<8x1xf32, #tpu.memory_space<vmem>>, vector<8x1xf32>
    %4 = vector.shape_cast %3 : vector<8x1xf32> to vector<8x1xf32>
    %5 = vector.broadcast %4 : vector<8x1xf32> to vector<8x128xf32>
    %6 = vector.extract_strided_slice %1 {offsets = [0, 0], sizes = [8, 1], strides = [1, 1]} : vector<8x4xf32> to vector<8x1xf32>
    %7 = vector.extract_strided_slice %0 {offsets = [0, 0], sizes = [1, 128], strides = [1, 1]} : vector<4x128xf32> to vector<1x128xf32>
    %8 = vector.broadcast %6 : vector<8x1xf32> to vector<8x128xf32>
    %9 = vector.broadcast %7 : vector<1x128xf32> to vector<8x128xf32>
    %10 = arith.mulf %8, %9 : vector<8x128xf32>
    %11 = arith.addf %5, %10 : vector<8x128xf32>
    %12 = vector.extract_strided_slice %1 {offsets = [0, 1], sizes = [8, 1], strides = [1, 1]} : vector<8x4xf32> to vector<8x1xf32>
    %13 = vector.extract_strided_slice %0 {offsets = [1, 0], sizes = [1, 128], strides = [1, 1]} : vector<4x128xf32> to vector<1x128xf32>
    %14 = vector.broadcast %12 : vector<8x1xf32> to vector<8x128xf32>
    %15 = vector.broadcast %13 : vector<1x128xf32> to vector<8x128xf32>
    %16 = arith.mulf %14, %15 : vector<8x128xf32>
    %17 = arith.addf %11, %16 : vector<8x128xf32>
    %18 = vector.extract_strided_slice %1 {offsets = [0, 2], sizes = [8, 1], strides = [1, 1]} : vector<8x4xf32> to vector<8x1xf32>
    %19 = vector.extract_strided_slice %0 {offsets = [2, 0], sizes = [1, 128], strides = [1, 1]} : vector<4x128xf32> to vector<1x128xf32>
    %20 = vector.broadcast %18 : vector<8x1xf32> to vector<8x128xf32>
    %21 = vector.broadcast %19 : vector<1x128xf32> to vector<8x128xf32>
    %22 = arith.mulf %20, %21 : vector<8x128xf32>
    %23 = arith.addf %17, %22 : vector<8x128xf32>
    %24 = vector.extract_strided_slice %1 {offsets = [0, 3], sizes = [8, 1], strides = [1, 1]} : vector<8x4xf32> to vector<8x1xf32>
    %25 = vector.extract_strided_slice %0 {offsets = [3, 0], sizes = [1, 128], strides = [1, 1]} : vector<4x128xf32> to vector<1x128xf32>
    %26 = vector.broadcast %24 : vector<8x1xf32> to vector<8x128xf32>
    %27 = vector.broadcast %25 : vector<1x128xf32> to vector<8x128xf32>
    %28 = arith.mulf %26, %27 : vector<8x128xf32>
    %29 = arith.addf %23, %28 : vector<8x128xf32>
    %30 = math.tanh %29 : vector<8x128xf32>
    %31 = vector.extract_strided_slice %2 {offsets = [0, 0], sizes = [8, 1], strides = [1, 1]} : vector<8x4xf32> to vector<8x1xf32>
    %32 = vector.broadcast %31 : vector<8x1xf32> to vector<8x128xf32>
    %33 = arith.mulf %32, %30 : vector<8x128xf32>
    %cst = arith.constant dense<0.000000e+00> : vector<128xf32>
    %34 = vector.multi_reduction <add>, %33, %cst [0] : vector<8x128xf32> to vector<128xf32>
    %35 = vector.shape_cast %34 : vector<128xf32> to vector<1x128xf32>
    %c0_7 = arith.constant 0 : index
    %c0_8 = arith.constant 0 : index
    %36 = vector.load %arg6[%c0_7, %c0_8] : memref<4x128xf32, #tpu.memory_space<vmem>>, vector<1x128xf32>
    tpu.vector_store %arg6[%c0_7, %c0_8], %35 {strides = array<i32>} : memref<4x128xf32, #tpu.memory_space<vmem>>, vector<1x128xf32>,
    %37 = vector.extract_strided_slice %2 {offsets = [0, 1], sizes = [8, 1], strides = [1, 1]} : vector<8x4xf32> to vector<8x1xf32>
    %38 = vector.broadcast %37 : vector<8x1xf32> to vector<8x128xf32>
    %39 = arith.mulf %38, %30 : vector<8x128xf32>
    %cst_9 = arith.constant dense<0.000000e+00> : vector<128xf32>
    %40 = vector.multi_reduction <add>, %39, %cst_9 [0] : vector<8x128xf32> to vector<128xf32>
    %41 = vector.shape_cast %40 : vector<128xf32> to vector<1x128xf32>
    %c1 = arith.constant 1 : index
    %c0_10 = arith.constant 0 : index
    %42 = vector.load %arg6[%c1, %c0_10] : memref<4x128xf32, #tpu.memory_space<vmem>>, vector<1x128xf32>
    tpu.vector_store %arg6[%c1, %c0_10], %41 {strides = array<i32>} : memref<4x128xf32, #tpu.memory_space<vmem>>, vector<1x128xf32>,
    %43 = vector.extract_strided_slice %2 {offsets = [0, 2], sizes = [8, 1], strides = [1, 1]} : vector<8x4xf32> to vector<8x1xf32>
    %44 = vector.broadcast %43 : vector<8x1xf32> to vector<8x128xf32>
    %45 = arith.mulf %44, %30 : vector<8x128xf32>
    %cst_11 = arith.constant dense<0.000000e+00> : vector<128xf32>
    %46 = vector.multi_reduction <add>, %45, %cst_11 [0] : vector<8x128xf32> to vector<128xf32>
    %47 = vector.shape_cast %46 : vector<128xf32> to vector<1x128xf32>
    %c2 = arith.constant 2 : index
    %c0_12 = arith.constant 0 : index
    %48 = vector.load %arg6[%c2, %c0_12] : memref<4x128xf32, #tpu.memory_space<vmem>>, vector<1x128xf32>
    tpu.vector_store %arg6[%c2, %c0_12], %47 {strides = array<i32>} : memref<4x128xf32, #tpu.memory_space<vmem>>, vector<1x128xf32>,
    %49 = vector.extract_strided_slice %2 {offsets = [0, 3], sizes = [8, 1], strides = [1, 1]} : vector<8x4xf32> to vector<8x1xf32>
    %50 = vector.broadcast %49 : vector<8x1xf32> to vector<8x128xf32>
    %51 = arith.mulf %50, %30 : vector<8x128xf32>
    %cst_13 = arith.constant dense<0.000000e+00> : vector<128xf32>
    %52 = vector.multi_reduction <add>, %51, %cst_13 [0] : vector<8x128xf32> to vector<128xf32>
    %53 = vector.shape_cast %52 : vector<128xf32> to vector<1x128xf32>
    %c3 = arith.constant 3 : index
    %c0_14 = arith.constant 0 : index
    %54 = vector.load %arg6[%c3, %c0_14] : memref<4x128xf32, #tpu.memory_space<vmem>>, vector<1x128xf32>
    tpu.vector_store %arg6[%c3, %c0_14], %53 {strides = array<i32>} : memref<4x128xf32, #tpu.memory_space<vmem>>, vector<1x128xf32>,
    %55 = arith.mulf %30, %30 : vector<8x128xf32>
    %cst_15 = arith.constant 1.000000e+00 : f32
    %56 = vector.broadcast %cst_15 : f32 to vector<8x128xf32>
    %57 = arith.subf %56, %55 : vector<8x128xf32>
    %c0_16 = arith.constant 0 : index
    %c0_17 = arith.constant 0 : index
    %58 = vector.load %arg5[%c0_16, %c0_17] : memref<8x1xf32, #tpu.memory_space<vmem>>, vector<8x1xf32>
    %59 = vector.broadcast %58 : vector<8x1xf32> to vector<8x128xf32>
    %60 = arith.mulf %59, %57 : vector<8x128xf32>
    %cst_18 = arith.constant dense<0.000000e+00> : vector<128xf32>
    %61 = vector.multi_reduction <add>, %60, %cst_18 [0] : vector<8x128xf32> to vector<128xf32>
    %62 = vector.shape_cast %61 : vector<128xf32> to vector<1x128xf32>
    %c0_19 = arith.constant 0 : index
    %c0_20 = arith.constant 0 : index
    %63 = vector.load %arg7[%c0_19, %c0_20] : memref<1x128xf32, #tpu.memory_space<vmem>>, vector<1x128xf32>
    tpu.vector_store %arg7[%c0_19, %c0_20], %62 {strides = array<i32>} : memref<1x128xf32, #tpu.memory_space<vmem>>, vector<1x128xf32>,
    return
  }
  func.func @transform_0(%arg0: i32) -> (i32, i32) {
    %c0_i32 = arith.constant 0 : i32
    %c0_i32_0 = arith.constant 0 : i32
    return %c0_i32, %arg0 : i32, i32
  }
  func.func @transform_1(%arg0: i32) -> (i32, i32) {
    %c0_i32 = arith.constant 0 : i32
    %c0_i32_0 = arith.constant 0 : i32
    %c0_i32_1 = arith.constant 0 : i32
    return %c0_i32, %c0_i32_0 : i32, i32
  }
  func.func @transform_2(%arg0: i32) -> (i32, i32) {
    %c0_i32 = arith.constant 0 : i32
    %c0_i32_0 = arith.constant 0 : i32
    %c0_i32_1 = arith.constant 0 : i32
    return %c0_i32, %c0_i32_0 : i32, i32
  }
  func.func @transform_3(%arg0: i32) -> (i32, i32) {
    %c0_i32 = arith.constant 0 : i32
    %c0_i32_0 = arith.constant 0 : i32
    %c0_i32_1 = arith.constant 0 : i32
    return %c0_i32, %c0_i32_0 : i32, i32
  }
  func.func @transform_4(%arg0: i32) -> (i32, i32) {
    %c0_i32 = arith.constant 0 : i32
    %c0_i32_0 = arith.constant 0 : i32
    %c0_i32_1 = arith.constant 0 : i32
    return %c0_i32, %c0_i32_0 : i32, i32
  }
  func.func @transform_5(%arg0: i32) -> (i32, i32) {
    %c0_i32 = arith.constant 0 : i32
    %c0_i32_0 = arith.constant 0 : i32
    return %c0_i32, %arg0 : i32, i32
  }
  func.func @transform_6(%arg0: i32) -> (i32, i32) {
    %c0_i32 = arith.constant 0 : i32
    %c0_i32_0 = arith.constant 0 : i32
    return %c0_i32, %arg0 : i32, i32
  }
}

</mosaic_0001>

<bundles_post_ra>
// kernel: tpu_custom_call.1
= control target key start
LH: loop header
LB: loop body
LE: loop exit
PB: predicated region body
PF: predicated region fallthrough
CT: control target
= control target key end

     0   :  { %12 = vsyncpa [#allocation3], 0  ;;  %v230_v1 = vmov 0   ;;  %v231_v2 = vmov 1   ;;  %s292_s0 = inlined_call_operand.vmem [shape: f32[4,128], index: 0, kind: input, shape index: {}]   ;;  %s293_s1 = inlined_call_operand.vmem [shape: f32[8,4], index: 1, kind: input, shape index: {}]   ;;  %s294_s2 = inlined_call_operand.vmem [shape: f32[8,4], index: 2, kind: input, shape index: {}]   ;;  %s295_s3 = inlined_call_operand.vmem [shape: f32[8,1], index: 3, kind: input, shape index: {}]   ;;  %s296_s4 = inlined_call_operand.vmem [shape: f32[8,1], index: 4, kind: input, shape index: {}]   ;;  %s297_s5 = inlined_call_operand.hbm [shape: f32[4,128], index: 5, kind: output, shape index: {0}]   ;;  %s298_s6 = inlined_call_operand.hbm [shape: f32[1,128], index: 6, kind: output, shape index: {1}]  }
   0x1   :  { %v25_v0 = vld [vmem:[%s293_s1] sm:$0xff]  ;;  %174 = vset.pattern.permute.xlu0 %v230_v1  ;;  %175 = vset.pattern.permute.xlu1 %v231_v2 }
   0x2   :  { %35 = vperm.xlu0 %174, %v25_v0   ;;  %45 = vperm.xlu1 %175, %v25_v0  }
   0x3   :  { %13 = vsyncpa [#allocation5], 0  ;;  %v27_v3 = vld [vmem:[%s295_s3] sm:$0xff]  ;;  %v232_v4 = vmov 2   ;;  %v233_v6 = vmov 3   ;;  %v38_v8 = vlaneseq  ;;  %s235_s28 = smov [#allocation4]  }
   0x4   :  { %v26_v5 = vld [vmem:[%s294_s2] sm:$0xff]  ;;  %s156_s29 = sshll.u32 %s235_s28, 4  ;;  %s157_s29 = int_to_ptr.vmem [resolvable:$true] %s156_s29 }
   0x5   :  { %v126_v7 = vld [vmem:[%s296_s4] sm:$0xff]  ;;  %v39_v9 = vshrl.u32 %v38_v8, 7 }
   0x6   :  { %30 = vperm.xlu0 %174, %v27_v3   ;;  %176 = vset.pattern.permute.xlu1 %v232_v4  ;;  %v24_v11 = vld [vmem:[%s292_s0] sm:$0xf]  ;;  %s234_s0 = smov [#allocation2]  }
   0x7   :  { %55 = vperm.xlu1 %176, %v25_v0   ;;  %v40_v10 = vsub.s32 0, %v39_v9  ;;  %v50_v12 = vsub.s32 1, %v39_v9  ;;  %v60_v13 = vsub.s32 2, %v39_v9  ;;  %v70_v19 = vsub.s32 3, %v39_v9  ;;  %s146_s4 = sshll.u32 %s234_s0, 4  ;;  %s147_s4 = int_to_ptr.vmem [resolvable:$true] %s146_s4 }
   0x8   :  { %s186_s30 = scalar_lea.vmem %s147_s4, 64  ;;  %p191_p1 = scmp.lt.s32.totalorder %s147_s4, %s147_s4 }
   0x9   :  { %v41_v14 = vrot.slane %v24_v11, %v40_v10  ;;  %v51_v17 = vrot.slane %v24_v11, %v50_v12  ;;  %v61_v18 = vrot.slane %v24_v11, %v60_v13  ;;  %v71_v26 = vrot.slane %v24_v11, %v70_v19  ;;  %p187_p0 = scmp.ne.s32.totalorder %s147_s4, %s186_s30  ;;  %p192_p2 = scmp.lt.s32.totalorder %s186_s30, %s186_s30 }
   0xa   :  { %177 = vset.pattern.permute.xlu0 %v233_v6 }
   0xb   :  { %65 = vperm.xlu0 %177, %v25_v0   ;;  %178 = vset.pattern.permute.xlu1 %v230_v1  ;;  %p193_p3 = por %p192_p2, %p191_p1 }
   0xc   :  { %77 = vperm.xlu1 %178, %v26_v5  }
   0xd   :  { %p194_p4 = pnand %p193_p3, %p187_p0 }
   0xf   :  { %180 = vset.pattern.permute.xlu0 %v232_v4 }
  0x10   :  { %179 = vset.pattern.permute.xlu1 %v231_v2  ;;  %101 = vperm.xlu0 %180, %v26_v5  }
  0x11   :  { %89 = vperm.xlu1 %179, %v26_v5  }
  0x14   :  { %183 = vset.pattern.permute.xlu0 %v230_v1 }
  0x15   :  { %181 = vset.pattern.permute.xlu1 %v233_v6 }
  0x16   :  { %113 = vperm.xlu1 %181, %v26_v5  }
  0x1a   :  { %182 = vset.pattern.permute.xlu1 %v230_v1 }
  0x1b   :  { %129 = vperm.xlu1 %182, %v126_v7  }
  0x7d   :  { %v36_v15 = vpop.permute.xlu0 %35  ;;  %v46_v16 = vpop.permute.xlu1 %45 }
  0x7e   :  { %v42_v20 = vmul.f32 %v41_v14, %v36_v15  ;;  %v52_v22 = vmul.f32 %v51_v17, %v46_v16 }
  0x81   :  { %v31_v21 = vpop.permute.xlu0 %30 }
  0x82   :  { %v43_v23 = vadd.f32 %v42_v20, %v31_v21  ;;  %v56_v24 = vpop.permute.xlu1 %55 }
  0x83   :  { %v62_v25 = vmul.f32 %v61_v18, %v56_v24 }
  0x84   :  { %v53_v27 = vadd.f32 %v52_v22, %v43_v23 }
  0x86   :  { %v63_v28 = vadd.f32 %v62_v25, %v53_v27  ;;  %v66_v29 = vpop.permute.xlu0 %65 }
  0x87   :  { %v72_v30 = vmul.f32 %v71_v26, %v66_v29  ;;  %v78_v32 = vpop.permute.xlu1 %77 }
  0x89   :  { %v73_v31 = vadd.f32 %v72_v30, %v63_v28 }
  0x8b   :  { %184 = vtanh.f32 %v73_v31  ;;  %v102_v35 = vpop.permute.xlu0 %101 }
  0x8c   :  { %v90_v33 = vpop.permute.xlu1 %89 }
  0x91   :  { %v114_v34 = vpop.permute.xlu1 %113 }
  0x96   :  { %v130_v46 = vpop.permute.xlu1 %129 }
  0x98   :  { %v185_v36 = vpop.eup %184 }
  0x99   :  { %v80_v37 = vmul.f32 %v185_v36, %v78_v32  ;;  %v92_v38 = vmul.f32 %v185_v36, %v90_v33  ;;  %v116_v39 = vmul.f32 %v185_v36, %v114_v34  ;;  %v104_v40 = vmul.f32 %v185_v36, %v102_v35 }
  0x9a   :  { %v124_v41 = vmul.f32 %v185_v36, %v185_v36 }
  0x9b   :  { %v81_v42 = vrot.slane %v80_v37, 4  ;;  %v93_v43 = vrot.slane %v92_v38, 4  ;;  %v117_v44 = vrot.slane %v116_v39, 4  ;;  %v105_v45 = vrot.slane %v104_v40, 4 }
  0x9c   :  { %v125_v47 = vsub.f32 1.0, %v124_v41 }
  0x9d   :  { %v82_v48 = vadd.f32 %v81_v42, %v80_v37  ;;  %v94_v49 = vadd.f32 %v93_v43, %v92_v38  ;;  %v118_v50 = vadd.f32 %v117_v44, %v116_v39  ;;  %v106_v51 = vadd.f32 %v105_v45, %v104_v40 }
  0x9e   :  { %v132_v52 = vmul.f32 %v130_v46, %v125_v47 }
  0x9f   :  { %v83_v53 = vrot.slane %v82_v48, 2  ;;  %v95_v54 = vrot.slane %v94_v49, 2  ;;  %v119_v55 = vrot.slane %v118_v50, 2  ;;  %v107_v56 = vrot.slane %v106_v51, 2 }
  0xa0   :  { %v133_v57 = vrot.slane %v132_v52, 4 }
  0xa1   :  { %v84_v58 = vadd.f32 %v83_v53, %v82_v48  ;;  %v96_v59 = vadd.f32 %v95_v54, %v94_v49  ;;  %v120_v60 = vadd.f32 %v119_v55, %v118_v50  ;;  %v108_v61 = vadd.f32 %v107_v56, %v106_v51 }
  0xa2   :  { %v134_v62 = vadd.f32 %v133_v57, %v132_v52 }
  0xa3   :  { %v85_v63 = vrot.slane %v84_v58, 1  ;;  %v97_v0 = vrot.slane %v96_v59, 1  ;;  %v121_v1 = vrot.slane %v120_v60, 1  ;;  %v109_v2 = vrot.slane %v108_v61, 1 }
  0xa4   :  { %v135_v3 = vrot.slane %v134_v62, 2 }
  0xa5   :  { %v86_v4 = vadd.f32 %v85_v63, %v84_v58  ;;  %v98_v5 = vadd.f32 %v97_v0, %v96_v59  ;;  %v110_v6 = vadd.f32 %v109_v2, %v108_v61  ;;  %v122_v7 = vadd.f32 %v121_v1, %v120_v60 }
  0xa6   :  { %v136_v8 = vadd.f32 %v135_v3, %v134_v62 }
  0xa7   :  { %87 = vst [vmem:[#allocation2] sm:$0x1] %v86_v4  ;;  %99 = vst [vmem:[#allocation2 + $0x1] sm:$0x1] %v98_v5 }
  0xa8   :  { %111 = vst [vmem:[#allocation2 + $0x2] sm:$0x1] %v110_v6  ;;  %123 = vst [vmem:[#allocation2 + $0x3] sm:$0x1] %v122_v7 }
  0xa9   :  { %197 = shalt.err (!%p194_p4)
}
  0xaa   :  { %149 = dma.vmem_to_hbm [thread:$0]  %s147_s4, 64, %s297_s5, [#allocation3]   ;;  %v137_v9 = vrot.slane %v136_v8, 1 }
  0xab   :  { %s206_s9 = scalar_lea.vmem %s157_s29, 16  ;;  %s210_s10 = scalar_lea.vmem %s157_s29, 32 }
  0xac   :  { %v138_v10 = vadd.f32 %v137_v9, %v136_v8  ;;  %p207_p5 = scmp.ne.s32.totalorder %s157_s29, %s206_s9  ;;  %p211_p6 = scmp.lt.s32.totalorder %s157_s29, %s157_s29 }
  0xad   :  { %p212_p7 = scmp.lt.s32.totalorder %s210_s10, %s206_s9 }
  0xae   :  { %139 = vst [vmem:[#allocation4] sm:$0x1] %v138_v10 }
  0xaf   :  { %p213_p8 = por %p212_p7, %p211_p6 }
  0xb1   :  { %p214_p9 = pnand %p213_p8, %p207_p5 }
  0xb3   :  { %217 = shalt.err (!%p214_p9)
}
  0xb4   :  { %159 = dma.vmem_to_hbm [thread:$0]  %s157_s29, 16, %s298_s6, [#allocation5]  }
  0xb5   :  { %226 = dma.done.wait [#allocation3], 64  }
  0xb6   :  { %227 = vsyncadd [#allocation3], 4294967232 }
  0xb7   :  { %228 = dma.done.wait [#allocation5], 16  }
  0xb8   :  { %229 = vsyncadd [#allocation5], 4294967280 }
  0xb9   :  { %166 = vsyncpa [#allocation3], 1 }
  0xba   :  { %167 = vsyncpa [#allocation5], 1 }

</bundles_post_ra>
